<compile_context>
chip_gen: v5e
topology: v5e:2x2
jax: 0.10.0
libtpu: 0.0.40
codegen_flags: <defaults>
</compile_context>

<pallas_src>
from typing import Optional

import numpy as np
import jax
import jax.numpy as jnp
from jax.experimental import pallas as pl
from jax.experimental.pallas import tpu as pltpu


# ----------------------------- helpers (host-side glue) -----------------------------

def _make_divisible(v: float, divisor: int, min_value: Optional[int] = None) -> int:
    if min_value is None:
        min_value = divisor
    new_v = max(min_value, int(v + divisor / 2) // divisor * divisor)
    if new_v < 0.9 * v:
        new_v += divisor
    return new_v


def _avgpool_matrix(size: int, kernel: int = 5, stride: int = 4, pad: int = 2) -> np.ndarray:
    """1-D operator for AvgPool2d(k,stride,pad), count_include_pad=True (separable)."""
    out = (size + 2 * pad - kernel) // stride + 1
    m = np.zeros((out, size), dtype=np.float32)
    for i in range(out):
        start = i * stride - pad
        for k in range(kernel):
            j = start + k
            if 0 <= j < size:
                m[i, j] = 1.0 / kernel  # divisor is always `kernel` (count_include_pad=True)
    return m


def _bilinear_up_matrix(in_size: int, scale: int) -> np.ndarray:
    """1-D operator for UpsamplingBilinear2d(scale_factor), align_corners=True (separable)."""
    out = in_size * scale
    m = np.zeros((out, in_size), dtype=np.float32)
    if in_size == 1:
        m[:, 0] = 1.0
        return m
    for i in range(out):
        src = i * (in_size - 1) / (out - 1)
        lo = int(np.floor(src))
        hi = min(lo + 1, in_size - 1)
        frac = src - lo
        m[i, lo] += 1.0 - frac
        m[i, hi] += frac
    return m


def _tensorcores_per_chip() -> int:
    """Best-effort TensorCores per JAX device (grid gets one block per core)."""
    try:
        kind = jax.devices()[0].device_kind.lower()
    except Exception:
        return 1
    if "v7" in kind or "v4" in kind:   # 2 TCs per device (megacore)
        return 2
    return 1                           # v5e / v6e: 1 TC per device


def _vmem_block_bytes(shape, dtype) -> int:
    """VMEM footprint of a 2-D block after Mosaic (sublane, lane) tile padding."""
    itemsize = int(np.dtype(dtype).itemsize)
    sub = 8 * max(1, 4 // itemsize)            # f32: 8 sublanes, bf16: 16
    rows, cols = int(shape[0]), int(shape[1])
    rows_p = -(-rows // sub) * sub
    cols_p = -(-cols // 128) * 128
    return rows_p * cols_p * itemsize


# ----------------------------------- Pallas kernel -----------------------------------

def lsa_kernel(x_ref, pt_ref, ut_ref, w1_ref, b1_ref, w2_ref, b2_ref, out_ref):
    # x_ref: (Nb*C, HW)           pt_ref: (HW, Sp) bf16     ut_ref: (Sp, HW) bf16
    # w1_ref: (Nb*mip, Nb*C) f32  b1_ref: (Nb*mip, 1) f32   (block-diagonal kron(I_Nb, W))
    # w2_ref: (Nb*C, Nb*mip) f32  b2_ref: (Nb*C, 1) f32
    x = x_ref[...]                                                   # (Nb*C, HW)

    # AvgPool2d(5, stride=4, pad=2): pooled = x @ P^T  (bf16 MXU, f32 accumulate)
    pooled = jnp.dot(x.astype(jnp.bfloat16), pt_ref[...],
                     preferred_element_type=jnp.float32)             # (Nb*C, Sp)

    # Conv1x1 inp->mip with eval-mode BN + bias folded in (tiny, f32, block-diagonal)
    y = jnp.dot(w1_ref[...], pooled,
                preferred_element_type=jnp.float32) + b1_ref[...]    # (Nb*mip, Sp)

    # Hardswish: y * relu6(y + 3) / 6
    y = y * jnp.clip(y + 3.0, 0.0, 6.0) * (1.0 / 6.0)

    # Conv1x1 mip->inp + bias (tiny, f32, block-diagonal)
    z = jnp.dot(w2_ref[...], y,
                preferred_element_type=jnp.float32) + b2_ref[...]    # (Nb*C, Sp)

    # Bilinear x4 upsample (align_corners=True): up = z @ U^T (bf16 MXU, f32 accumulate)
    up = jnp.dot(z.astype(jnp.bfloat16), ut_ref[...],
                 preferred_element_type=jnp.float32)                 # (Nb*C, HW) lane-dense

    # Sigmoid gate (f32 math) + identity multiply, lane-dense store over HW.
    out_ref[...] = (x.astype(jnp.float32) * jax.nn.sigmoid(up)).astype(out_ref.dtype)


# ------------------------------------- wrapper ----------------------------------------

def lsa_forward(x_nchw, params, stride: int = 4):
    n, c, h, w = x_nchw.shape
    w1, b1, gamma, beta, r_mean, r_var, eps, w2, b2 = params
    mip = w1.shape[0]

    # Separable 1-D spatial operators (host-side, once).
    ah = _avgpool_matrix(h, 5, stride, 2)
    aw = _avgpool_matrix(w, 5, stride, 2)
    hp, wp = ah.shape[0], aw.shape[0]
    uh = _bilinear_up_matrix(hp, stride)
    uw = _bilinear_up_matrix(wp, stride)
    assert uh.shape[0] == h and uw.shape[0] == w, "upsampled size must match input spatial size"

    sp = hp * wp
    hw = h * w

    # Transposed dense operators for the channel-major orientation, bf16 for the MXU.
    pt = jnp.asarray(np.kron(ah, aw).T, dtype=jnp.bfloat16)   # (HW, Sp)
    ut = jnp.asarray(np.kron(uh, uw).T, dtype=jnp.bfloat16)   # (Sp, HW)

    # Fold eval-mode BatchNorm and the conv1 bias into the conv1 weight (host-side, once).
    bn_scale = gamma / jnp.sqrt(r_var + eps)                   # (mip,)
    bn_shift = beta - r_mean * bn_scale
    w1f = (w1 * bn_scale[:, None]).astype(jnp.float32)         # (mip, C)
    b1f = (b1 * bn_scale + bn_shift).astype(jnp.float32)       # (mip,)
    w2f = w2.astype(jnp.float32)                               # (C, mip)
    b2f = b2.astype(jnp.float32)                               # (C,)

    # One grid block per TensorCore (1 on v5e/v6e, 2 on v7x) when N divides evenly.
    num_blocks = _tensorcores_per_chip()
    if num_blocks < 1 or n % num_blocks != 0:
        num_blocks = 1
    nb = n // num_blocks          # batches handled per grid block
    nbc = nb * c                  # MXU rows per grid block

    # Block-diagonal channel-mix weights so the whole body is plain 2-D matmuls with batch
    # folded into the MXU M dimension (row order within a block is b*C + c).
    eye = jnp.eye(nb, dtype=jnp.float32)
    w1_big = jnp.kron(eye, w1f)                                # (nb*mip, nb*C)
    w2_big = jnp.kron(eye, w2f)                                # (nb*C, nb*mip)
    b1_big = jnp.tile(b1f, nb).reshape(nb * mip, 1)
    b2_big = jnp.tile(b2f, nb).reshape(nbc, 1)

    # NCHW -> (N*C, H*W): a free reshape (no transpose, no extra HBM pass). Dtype-preserving
    # for f32/bf16 activations (bf16 I/O halves the dominant HBM traffic).
    if x_nchw.dtype not in (jnp.float32, jnp.bfloat16):
        x_nchw = x_nchw.astype(jnp.float32)
    out_dtype = x_nchw.dtype
    x2d = x_nchw.reshape(n * c, hw)

    # Advisory cost estimate for XLA's scheduler.
    flops = (2 * (n * c) * hw * sp                       # pool matmul
             + 2 * num_blocks * (nb * mip) * nbc * sp    # conv1 (block-diag)
             + 2 * num_blocks * nbc * (nb * mip) * sp    # conv2 (block-diag)
             + 2 * (n * c) * sp * hw                     # upsample matmul
             + 10 * n * c * hw)                          # hardswish / gate elementwise
    transcendentals = n * c * hw                         # sigmoid
    bytes_accessed = (n * c * hw * int(np.dtype(out_dtype).itemsize) * 2   # x in + out out
                      + (pt.size + ut.size) * 2                            # P^T + U^T (bf16)
                      + (w1_big.size + w2_big.size + b1_big.size + b2_big.size) * 4)

    # Explicit VMEM budget including (sublane, lane) tile padding (Sp=16 pads to 128 lanes).
    block_bytes = (
        2 * _vmem_block_bytes((nbc, hw), out_dtype)          # x block (double-buffered)
        + 2 * _vmem_block_bytes((nbc, hw), out_dtype)        # out block
        + 2 * _vmem_block_bytes((hw, sp), jnp.bfloat16)      # P^T
        + 2 * _vmem_block_bytes((sp, hw), jnp.bfloat16)      # U^T
        + 2 * (_vmem_block_bytes(w1_big.shape, jnp.float32)
               + _vmem_block_bytes(w2_big.shape, jnp.float32)
               + _vmem_block_bytes(b1_big.shape, jnp.float32)
               + _vmem_block_bytes(b2_big.shape, jnp.float32))
        # in-kernel f32 temporaries: pooled / y / z (Sp lanes) + up + gate (HW lanes)
        + 3 * _vmem_block_bytes((nbc, sp), jnp.float32)
        + 2 * _vmem_block_bytes((nbc, hw), jnp.float32))
    vmem_limit = int(min(96 * 2**20, max(16 * 2**20, 2 * block_bytes)))

    out2d = pl.pallas_call(
        lsa_kernel,
        out_shape=jax.ShapeDtypeStruct((n * c, hw), out_dtype),
        grid_spec=pltpu.PrefetchScalarGridSpec(
            num_scalar_prefetch=0,
            grid=(num_blocks,),
            in_specs=[
                pl.BlockSpec((nbc, hw), lambda i: (i, 0)),        # x rows for this block
                pl.BlockSpec((hw, sp), lambda i: (0, 0)),         # P^T pool operator (bf16)
                pl.BlockSpec((sp, hw), lambda i: (0, 0)),         # U^T upsample operator (bf16)
                pl.BlockSpec((nb * mip, nbc), lambda i: (0, 0)),  # conv1 weight (BN folded)
                pl.BlockSpec((nb * mip, 1), lambda i: (0, 0)),    # conv1 bias (BN folded)
                pl.BlockSpec((nbc, nb * mip), lambda i: (0, 0)),  # conv2 weight
                pl.BlockSpec((nbc, 1), lambda i: (0, 0)),         # conv2 bias
            ],
            out_specs=pl.BlockSpec((nbc, hw), lambda i: (i, 0)),
        ),
        compiler_params=pltpu.CompilerParams(
            dimension_semantics=("parallel",),
            vmem_limit_bytes=vmem_limit,
        ),
        cost_estimate=pl.CostEstimate(
            flops=int(flops),
            transcendentals=int(transcendentals),
            bytes_accessed=int(bytes_accessed),
        ),
    )(x2d, pt, ut, w1_big, b1_big, w2_big, b2_big)

    # (N*C, H*W) -> NCHW: free reshape.
    return out2d.reshape(n, c, h, w)


def lsa_reference(x_nchw, params, stride: int = 4):
    """Pure-JAX f32 reference (same linear-operator formulation) for self-check."""
    n, c, h, w = x_nchw.shape
    w1, b1, gamma, beta, r_mean, r_var, eps, w2, b2 = params
    ah = _avgpool_matrix(h, 5, stride, 2)
    aw = _avgpool_matrix(w, 5, stride, 2)
    uh = _bilinear_up_matrix(ah.shape[0], stride)
    uw = _bilinear_up_matrix(aw.shape[0], stride)
    P = jnp.asarray(np.kron(ah, aw), dtype=jnp.float32)    # (Sp, HW)
    U = jnp.asarray(np.kron(uh, uw), dtype=jnp.float32)    # (HW, Sp)
    x = x_nchw.reshape(n, c, h * w).astype(jnp.float32)
    pooled = jnp.einsum('ncq,sq->ncs', x, P)
    y = jnp.einsum('mc,ncs->nms', w1, pooled) + b1[None, :, None]
    y = ((y - r_mean[None, :, None]) / jnp.sqrt(r_var[None, :, None] + eps)
         * gamma[None, :, None] + beta[None, :, None])
    y = y * jnp.clip(y + 3.0, 0.0, 6.0) / 6.0
    z = jnp.einsum('cm,nms->ncs', w2, y) + b2[None, :, None]
    up = jnp.einsum('qs,ncs->ncq', U, z)
    out = x * jax.nn.sigmoid(up)
    return out.reshape(n, c, h, w)


# --------------------------------------- main -------------------------------------------

if __name__ == "__main__":
    # Shapes consistent with the module: inp=16, stride=4, reduction=16 -> mip = 8
    N, C, H, W = 2, 16, 16, 16
    stride, reduction = 4, 16
    mip = _make_divisible(C // reduction, 8)

    key = jax.random.PRNGKey(0)
    ks = jax.random.split(key, 8)

    x = jax.random.normal(ks[0], (N, C, H, W), dtype=jnp.float32)

    # Conv1x1 weights in PyTorch orientation (out_ch, in_ch), plus biases.
    w1 = jax.random.normal(ks[1], (mip, C), dtype=jnp.float32) * 0.2
    b1 = jax.random.normal(ks[2], (mip,), dtype=jnp.float32) * 0.1
    w2 = jax.random.normal(ks[3], (C, mip), dtype=jnp.float32) * 0.2
    b2 = jax.random.normal(ks[4], (C,), dtype=jnp.float32) * 0.1

    # BatchNorm2d(mip), eval mode (running statistics).
    gamma = 1.0 + 0.1 * jax.random.normal(ks[5], (mip,), dtype=jnp.float32)
    beta = 0.1 * jax.random.normal(ks[6], (mip,), dtype=jnp.float32)
    r_mean = 0.05 * jax.random.normal(ks[7], (mip,), dtype=jnp.float32)
    r_var = jnp.ones((mip,), dtype=jnp.float32) * 0.9
    eps = 1e-5

    params = (w1, b1, gamma, beta, r_mean, r_var, eps, w2, b2)

    out = jax.block_until_ready(lsa_forward(x, params, stride=stride))
    ref = jax.block_until_ready(lsa_reference(x, params, stride=stride))

    assert out.shape == (N, C, H, W)
    # Tolerance loosened vs pure-f32 because the spatial matmuls run with bf16 operands
    # (f32 accumulation); pool weight 0.04 / bilinear fractions are not exact in bf16.
    np.testing.assert_allclose(np.asarray(out), np.asarray(ref), rtol=2e-2, atol=2e-2)

    print("KERNEL_OK")
</pallas_src>

<mosaic_0001>
module attributes {stable_mosaic.version = 11 : i64} {
  func.func @lsa_kernel(%arg0: i32, %arg1: memref<32x256xf32, #tpu.memory_space<vmem>>, %arg2: memref<256x16xbf16, #tpu.memory_space<vmem>>, %arg3: memref<16x256xbf16, #tpu.memory_space<vmem>>, %arg4: memref<16x32xf32, #tpu.memory_space<vmem>>, %arg5: memref<16x1xf32, #tpu.memory_space<vmem>>, %arg6: memref<32x16xf32, #tpu.memory_space<vmem>>, %arg7: memref<32x1xf32, #tpu.memory_space<vmem>>, %arg8: memref<32x256xf32, #tpu.memory_space<vmem>>) attributes {dimension_semantics = [#tpu.dimension_semantics<parallel>], iteration_bounds = array<i64: 1>, scalar_prefetch = 0 : i64, scratch_operands = 0 : i64, tpu.core_type = #tpu.core_type<tc>, window_params = [{transform_indices = @transform_0, window_bounds = array<i64: 32, 256>}, {pipeline_mode = #tpu.pipeline_mode<synchronous>, transform_indices = @transform_1, window_bounds = array<i64: 256, 16>}, {pipeline_mode = #tpu.pipeline_mode<synchronous>, transform_indices = @transform_2, window_bounds = array<i64: 16, 256>}, {pipeline_mode = #tpu.pipeline_mode<synchronous>, transform_indices = @transform_3, window_bounds = array<i64: 16, 32>}, {pipeline_mode = #tpu.pipeline_mode<synchronous>, transform_indices = @transform_4, window_bounds = array<i64: 16, 1>}, {pipeline_mode = #tpu.pipeline_mode<synchronous>, transform_indices = @transform_5, window_bounds = array<i64: 32, 16>}, {pipeline_mode = #tpu.pipeline_mode<synchronous>, transform_indices = @transform_6, window_bounds = array<i64: 32, 1>}, {transform_indices = @transform_7, window_bounds = array<i64: 32, 256>}]} {
    %c0 = arith.constant 0 : index
    %c0_0 = arith.constant 0 : index
    %0 = vector.load %arg1[%c0, %c0_0] : memref<32x256xf32, #tpu.memory_space<vmem>>, vector<32x256xf32>
    %1 = arith.truncf %0 : vector<32x256xf32> to vector<32x256xbf16>
    %c0_1 = arith.constant 0 : index
    %c0_2 = arith.constant 0 : index
    %2 = vector.load %arg2[%c0_1, %c0_2] : memref<256x16xbf16, #tpu.memory_space<vmem>>, vector<256x16xbf16>
    %cst = arith.constant dense<0.000000e+00> : vector<32x16xf32>
    %3 = tpu.matmul %1, %2, %cst {dimension_numbers = #tpu.dot_dimension_numbers<[1], [0], [0], [1], [0, 0, 1, 1], [], []>} : vector<32x256xbf16>, vector<256x16xbf16>, vector<32x16xf32> -> vector<32x16xf32>
    %c0_3 = arith.constant 0 : index
    %c0_4 = arith.constant 0 : index
    %4 = vector.load %arg4[%c0_3, %c0_4] : memref<16x32xf32, #tpu.memory_space<vmem>>, vector<16x32xf32>
    %cst_5 = arith.constant dense<0.000000e+00> : vector<16x16xf32>
    %5 = tpu.matmul %4, %3, %cst_5 {dimension_numbers = #tpu.dot_dimension_numbers<[1], [0], [0], [1], [0, 0, 1, 1], [], []>} : vector<16x32xf32>, vector<32x16xf32>, vector<16x16xf32> -> vector<16x16xf32>
    %c0_6 = arith.constant 0 : index
    %c0_7 = arith.constant 0 : index
    %6 = vector.load %arg5[%c0_6, %c0_7] : memref<16x1xf32, #tpu.memory_space<vmem>>, vector<16x1xf32>
    %7 = vector.broadcast %6 : vector<16x1xf32> to vector<16x16xf32>
    %8 = arith.addf %5, %7 : vector<16x16xf32>
    %cst_8 = arith.constant 3.000000e+00 : f32
    %9 = vector.broadcast %cst_8 : f32 to vector<16x16xf32>
    %10 = arith.addf %8, %9 : vector<16x16xf32>
    %cst_9 = arith.constant 0.000000e+00 : f32
    %cst_10 = arith.constant 6.000000e+00 : f32
    %11 = vector.broadcast %cst_9 : f32 to vector<16x16xf32>
    %12 = arith.maximumf %11, %10 : vector<16x16xf32>
    %13 = vector.broadcast %cst_10 : f32 to vector<16x16xf32>
    %14 = arith.minimumf %13, %12 : vector<16x16xf32>
    %15 = arith.mulf %8, %14 : vector<16x16xf32>
    %cst_11 = arith.constant 0.166666672 : f32
    %16 = vector.broadcast %cst_11 : f32 to vector<16x16xf32>
    %17 = arith.mulf %15, %16 : vector<16x16xf32>
    %c0_12 = arith.constant 0 : index
    %c0_13 = arith.constant 0 : index
    %18 = vector.load %arg6[%c0_12, %c0_13] : memref<32x16xf32, #tpu.memory_space<vmem>>, vector<32x16xf32>
    %cst_14 = arith.constant dense<0.000000e+00> : vector<32x16xf32>
    %19 = tpu.matmul %18, %17, %cst_14 {dimension_numbers = #tpu.dot_dimension_numbers<[1], [0], [0], [1], [0, 0, 1, 1], [], []>} : vector<32x16xf32>, vector<16x16xf32>, vector<32x16xf32> -> vector<32x16xf32>
    %c0_15 = arith.constant 0 : index
    %c0_16 = arith.constant 0 : index
    %20 = vector.load %arg7[%c0_15, %c0_16] : memref<32x1xf32, #tpu.memory_space<vmem>>, vector<32x1xf32>
    %21 = vector.broadcast %20 : vector<32x1xf32> to vector<32x16xf32>
    %22 = arith.addf %19, %21 : vector<32x16xf32>
    %23 = arith.truncf %22 : vector<32x16xf32> to vector<32x16xbf16>
    %c0_17 = arith.constant 0 : index
    %c0_18 = arith.constant 0 : index
    %24 = vector.load %arg3[%c0_17, %c0_18] : memref<16x256xbf16, #tpu.memory_space<vmem>>, vector<16x256xbf16>
    %cst_19 = arith.constant dense<0.000000e+00> : vector<32x256xf32>
    %25 = tpu.matmul %23, %24, %cst_19 {dimension_numbers = #tpu.dot_dimension_numbers<[1], [0], [0], [1], [0, 0, 1, 1], [], []>} : vector<32x16xbf16>, vector<16x256xbf16>, vector<32x256xf32> -> vector<32x256xf32>
    %26 = arith.negf %25 : vector<32x256xf32>
    %27 = math.exp %26 : vector<32x256xf32>
    %cst_20 = arith.constant 1.000000e+00 : f32
    %28 = vector.broadcast %cst_20 : f32 to vector<32x256xf32>
    %29 = arith.addf %28, %27 : vector<32x256xf32>
    %30 = arith.divf %28, %29 : vector<32x256xf32>
    %31 = arith.mulf %0, %30 : vector<32x256xf32>
    %c0_21 = arith.constant 0 : index
    %c0_22 = arith.constant 0 : index
    %32 = vector.load %arg8[%c0_21, %c0_22] : memref<32x256xf32, #tpu.memory_space<vmem>>, vector<32x256xf32>
    tpu.vector_store %arg8[%c0_21, %c0_22], %31 {strides = array<i32>} : memref<32x256xf32, #tpu.memory_space<vmem>>, vector<32x256xf32>,
    return
  }
  func.func @transform_0(%arg0: i32) -> (i32, i32) {
    %c0_i32 = arith.constant 0 : i32
    %c0_i32_0 = arith.constant 0 : i32
    return %arg0, %c0_i32 : i32, i32
  }
  func.func @transform_1(%arg0: i32) -> (i32, i32) {
    %c0_i32 = arith.constant 0 : i32
    %c0_i32_0 = arith.constant 0 : i32
    %c0_i32_1 = arith.constant 0 : i32
    return %c0_i32, %c0_i32_0 : i32, i32
  }
  func.func @transform_2(%arg0: i32) -> (i32, i32) {
    %c0_i32 = arith.constant 0 : i32
    %c0_i32_0 = arith.constant 0 : i32
    %c0_i32_1 = arith.constant 0 : i32
    return %c0_i32, %c0_i32_0 : i32, i32
  }
  func.func @transform_3(%arg0: i32) -> (i32, i32) {
    %c0_i32 = arith.constant 0 : i32
    %c0_i32_0 = arith.constant 0 : i32
    %c0_i32_1 = arith.constant 0 : i32
    return %c0_i32, %c0_i32_0 : i32, i32
  }
  func.func @transform_4(%arg0: i32) -> (i32, i32) {
    %c0_i32 = arith.constant 0 : i32
    %c0_i32_0 = arith.constant 0 : i32
    %c0_i32_1 = arith.constant 0 : i32
    return %c0_i32, %c0_i32_0 : i32, i32
  }
  func.func @transform_5(%arg0: i32) -> (i32, i32) {
    %c0_i32 = arith.constant 0 : i32
    %c0_i32_0 = arith.constant 0 : i32
    %c0_i32_1 = arith.constant 0 : i32
    return %c0_i32, %c0_i32_0 : i32, i32
  }
  func.func @transform_6(%arg0: i32) -> (i32, i32) {
    %c0_i32 = arith.constant 0 : i32
    %c0_i32_0 = arith.constant 0 : i32
    %c0_i32_1 = arith.constant 0 : i32
    return %c0_i32, %c0_i32_0 : i32, i32
  }
  func.func @transform_7(%arg0: i32) -> (i32, i32) {
    %c0_i32 = arith.constant 0 : i32
    %c0_i32_0 = arith.constant 0 : i32
    return %arg0, %c0_i32 : i32, i32
  }
}

</mosaic_0001>

<bundles_post_ra>
// kernel: tpu_custom_call.1
= control target key start
LH: loop header
LB: loop body
LE: loop exit
PB: predicated region body
PF: predicated region fallthrough
CT: control target
= control target key end

     0   :  { %s997_s0 = inlined_call_operand.vmem [shape: f32[32,256], index: 0, kind: input, shape index: {}]   ;;  %s998_s1 = inlined_call_operand.vmem [shape: bf16[256,16], index: 1, kind: input, shape index: {}]   ;;  %s999_s2 = inlined_call_operand.vmem [shape: bf16[16,256], index: 2, kind: input, shape index: {}]   ;;  %s1000_s3 = inlined_call_operand.vmem [shape: f32[16,32], index: 3, kind: input, shape index: {}]   ;;  %s1001_s4 = inlined_call_operand.vmem [shape: f32[16,1], index: 4, kind: input, shape index: {}]   ;;  %s1002_s5 = inlined_call_operand.vmem [shape: f32[32,16], index: 5, kind: input, shape index: {}]   ;;  %s1003_s6 = inlined_call_operand.vmem [shape: f32[32,1], index: 6, kind: input, shape index: {}]   ;;  %s1004_s7 = inlined_call_operand.hbm [shape: f32[32,256], index: 7, kind: output, shape index: {}]  }
   0x1   :  { %v671_v0 = vld [vmem:[%s998_s1 + $0x38] sm:$0xff]  ;;  %v670_v2 = vld [vmem:[%s998_s1 + $0x30] sm:$0xff]  ;;  %v669_v4 = vld [vmem:[%s998_s1 + $0x28] sm:$0xff] }
   0x2   :  { %v679_v1 = vld [vmem:[%s998_s1 + $0x78] sm:$0xff]  ;;  %168 = vmatpush.bf16.msra.mxu0 %v671_v0  ;;  %v678_v3 = vld [vmem:[%s998_s1 + $0x70] sm:$0xff]  ;;  %v677_v5 = vld [vmem:[%s998_s1 + $0x68] sm:$0xff] }
   0x3   :  { %187 = vmatpush.bf16.msra.mxu1 %v679_v1 }
   0x6   :  { %169 = vmatpush.bf16.msra.mxu0 %v670_v2 }
   0x7   :  { %188 = vmatpush.bf16.msra.mxu1 %v678_v3 }
   0x8   :  { %12 = vsyncpa [#allocation3], 0  ;;  %v668_v6 = vld [vmem:[%s998_s1 + $0x20] sm:$0xff]  ;;  %v667_v8 = vld [vmem:[%s998_s1 + $0x18] sm:$0xff]  ;;  %v747_v30 = vmov 0   ;;  %vm220_vm0 = vcmask 261120  }
   0x9   :  { %v676_v7 = vld [vmem:[%s998_s1 + $0x60] sm:$0xff]  ;;  %v675_v9 = vld [vmem:[%s998_s1 + $0x58] sm:$0xff]  ;;  %v666_v10 = vld [vmem:[%s998_s1 + $0x10] sm:$0xff]  ;;  %686 = vset.pattern.permute.xlu0 %v747_v30  ;;  %687 = vset.pattern.permute.xlu1 %v747_v30  ;;  %vm288_vm1 = vcmask 130048   ;;  %s562_s30 = sshll.u32 %s1004_s7, 4  ;;  %s749_s8 = smov 256   ;;  %s563_s30 = int_to_ptr.hbm [resolvable:$true] %s562_s30 }
   0xa   :  { %170 = vmatpush.bf16.msra.mxu0 %v669_v4  ;;  %v674_v11 = vld [vmem:[%s998_s1 + $0x50] sm:$0xff]  ;;  %v665_v12 = vld [vmem:[%s998_s1 + $0x8] sm:$0xff]  ;;  %v664_v14 = vld [vmem:[%s998_s1] sm:$0xff]  ;;  %688 = vset.pattern.permute.xlu2 %v747_v30 }
   0xb   :  { %189 = vmatpush.bf16.msra.mxu1 %v677_v5  ;;  %v673_v13 = vld [vmem:[%s998_s1 + $0x48] sm:$0xff]  ;;  %v672_v15 = vld [vmem:[%s998_s1 + $0x40] sm:$0xff]  ;;  %v847_v17 = vld [vmem:[%s997_s0 + $0x10] sm:$0xff] }
   0xc   :  { %v842_v16 = vld [vmem:[%s997_s0] sm:$0xff]  ;;  %v852_v18 = vld [vmem:[%s997_s0 + $0x8] sm:$0xff]  ;;  %v857_v19 = vld [vmem:[%s997_s0 + $0x18] sm:$0xff] }
   0xd   :  { %v36_v20 = vpack.c.bf16 %v847_v17, %v842_v16  ;;  %v37_v21 = vpack.c.bf16 %v857_v19, %v852_v18  ;;  %v866_v22 = vld [vmem:[%s997_s0 + $0x20] sm:$0xff]  ;;  %v871_v23 = vld [vmem:[%s997_s0 + $0x30] sm:$0xff]  ;;  %v876_v24 = vld [vmem:[%s997_s0 + $0x28] sm:$0xff] }
   0xe   :  { %171 = vmatpush.bf16.msra.mxu0 %v668_v6  ;;  %v881_v25 = vld [vmem:[%s997_s0 + $0x38] sm:$0xff]  ;;  %v38_v26 = vpack.c.bf16 %v871_v23, %v866_v22  ;;  %v209_v33 = vld [vmem:[%s1001_s4 + $0x8] sm:$0xff]  ;;  %v208_v36 = vld [vmem:[%s1001_s4] sm:$0xff]  ;;  %s750_s4 = smov 16  }
   0xf   :  { %190 = vmatpush.bf16.msra.mxu1 %v676_v7  ;;  %v39_v27 = vpack.c.bf16 %v881_v25, %v876_v24  ;;  %217 = vperm.xlu0 %686, %v209_v33   ;;  %v206_v43 = vld [vmem:[%s1000_s3] sm:$0xff]  ;;  %v207_v44 = vld [vmem:[%s1000_s3 + $0x8] sm:$0xff]  ;;  %v266_v59 = vld [vmem:[%s1003_s6 + $0x10] sm:$0xff] }
  0x10   :  { %v264_v48 = vld [vmem:[%s1003_s6] sm:$0xff]  ;;  %v265_v52 = vld [vmem:[%s1003_s6 + $0x8] sm:$0xff]  ;;  %280 = vperm.xlu2 %688, %v266_v59   ;;  %v267_v4 = vld [vmem:[%s1003_s6 + $0x18] sm:$0xff] }
  0x11   :  { %270 = vperm.xlu1 %687, %v264_v48   ;;  %v680_v62 = vld [vmem:[%s999_s2 + $0x4] sm:$0xf]  ;;  %v648_v63 = vld [vmem:[%s999_s2 + $0x8] sm:$0xf0]  ;;  %v262_v6 = vld [vmem:[%s1002_s5 + $0x10] sm:$0xff] }
  0x12   :  { %172 = vmatpush.bf16.msra.mxu0 %v667_v8  ;;  %v260_v2 = vld [vmem:[%s1002_s5] sm:$0xff]  ;;  %v651_v3 = vor.u32 %v680_v62, %v648_v63  ;;  %v261_v5 = vld [vmem:[%s1002_s5 + $0x8] sm:$0xff]  ;;  %v263_v7 = vld [vmem:[%s1002_s5 + $0x18] sm:$0xff] }
  0x13   :  { %191 = vmatpush.bf16.msra.mxu1 %v675_v9  ;;  %v646_v8 = vld [vmem:[%s999_s2] sm:$0xf]  ;;  %v681_v9 = vld [vmem:[%s999_s2 + $0x4] sm:$0xf0]  ;;  %s748_s2 = smov [#allocation2]  }
  0x14   :  { %s560_s5 = sshll.u32 %s748_s2, 4  ;;  %s561_s5 = int_to_ptr.vmem [resolvable:$true] %s560_s5 }
  0x16   :  { %173 = vmatpush.bf16.msra.mxu0 %v666_v10  ;;  %v647_v10 = vor.u32 %v681_v9, %v646_v8 }
  0x17   :  { %192 = vmatpush.bf16.msra.mxu1 %v674_v11  ;;  %212 = vperm.xlu0 %686, %v208_v36  }
  0x18   :  { %285 = vperm.xlu2 %688, %v267_v4  }
  0x19   :  { %275 = vperm.xlu1 %687, %v265_v52  }
  0x1a   :  { %174 = vmatpush.bf16.msra.mxu0 %v665_v12 }
  0x1b   :  { %193 = vmatpush.bf16.msra.mxu1 %v673_v13 }
  0x1e   :  { %175 = vmatpush.bf16.msra.mxu0 %v664_v14 }
  0x1f   :  { %194 = vmatpush.bf16.msra.mxu1 %v672_v15 }
  0x21   :  { %176 = vmatmul.bf16.vlgmr.msra.gmra.mxu0 %v36_v20 }
  0x22   :  { %195 = vmatmul.bf16.vlgmr.msra.gmra.mxu1 %v37_v21 }
  0x31   :  { %181 = vmatmul.bf16.gmra.mxu0 %v38_v26 }
  0x32   :  { %200 = vmatmul.bf16.gmra.mxu1 %v39_v27 }
  0x6a   :  { %v281_v26 = vpop.permute.xlu2 %280 }
  0x81   :  { %v218_v45 = vpop.permute.xlu0 %217 }
  0x83   :  { %v271_v11 = vpop.permute.xlu1 %270 }
  0x89   :  { %v213_v46 = vpop.permute.xlu0 %212 }
  0x8b   :  { %v276_v13 = vpop.permute.xlu1 %275 }
  0x9e   :  { %v177_v28 = vpop.f32.mrf.mxu0 }
  0x9f   :  { %v196_v29 = vpop.f32.mrf.mxu1 }
  0xa0   :  { %v197_v42 = vadd.f32 %v196_v29, %v177_v28  ;;  %v286_v28 = vpop.permute.xlu2 %285 }
  0xa6   :  { %v179_v31 = vpop.f32.mrf.mxu0 }
  0xa7   :  { %v198_v32 = vpop.f32.mrf.mxu1 }
  0xa8   :  { %v199_v41 = vadd.f32 %v198_v32, %v179_v31 }
  0xae   :  { %v182_v34 = vpop.f32.mrf.mxu0 }
  0xaf   :  { %v201_v35 = vpop.f32.mrf.mxu1 }
  0xb0   :  { %v202_v40 = vadd.f32 %v201_v35, %v182_v34 }
  0xb6   :  { %v184_v37 = vpop.f32.mrf.mxu0 }
  0xb7   :  { %v203_v38 = vpop.f32.mrf.mxu1 }
  0xb8   :  { %v204_v39 = vadd.f32 %v203_v38, %v184_v37 }
  0xba   :  { %239 = vmatpush.msra.mxu2 %v204_v39 }
  0xbc   :  { %240 = vmatpush.msra.mxu2 %v202_v40 }
  0xbe   :  { %241 = vmatpush.msra.mxu2 %v199_v41 }
  0xc0   :  { %242 = vmatpush.msra.mxu2 %v197_v42 }
  0xc1   :  { %638 = vmatmul.msk.f32.vlgmr.msra.gmra.mxu2 %vm220_vm0, %v206_v43 }
  0xc2   :  { %357 = vmatpush.bf16.msrb.mxu2 %v647_v10 }
  0xc9   :  { %639 = vmatmul.msk.f32.gmra.mxu2 %vm220_vm0, %v207_v44 }
 0x144   :  { %v244_v47 = vpop.f32.mrf.mxu2 }
 0x145   :  { %v245_v49 = vadd.f32 %v244_v47, %v213_v46 }
 0x147   :  { %v250_v50 = vadd.f32 3.0, %v245_v49 }
 0x149   :  { %v252_v53 = vmax.f32 %v250_v50, 0.0 }
 0x14b   :  { %v254_v56 = vmin.f32 %v252_v53, 6.0 }
 0x14c   :  { %v247_v51 = vpop.f32.mrf.mxu2 }
 0x14d   :  { %v248_v54 = vadd.f32 %v247_v51, %v218_v45  ;;  %v256_v61 = vmul.f32 %v254_v56, %v245_v49 }
 0x14f   :  { %v251_v55 = vadd.f32 3.0, %v248_v54  ;;  %v258_v1 = vmul.f32 0.16666667, %v256_v61 }
 0x151   :  { %v253_v57 = vmax.f32 %v251_v55, 0.0 }
 0x153   :  { %v255_v58 = vmin.f32 %v253_v57, 6.0 }
 0x155   :  { %v257_v60 = vmul.f32 %v255_v58, %v248_v54 }
 0x157   :  { %v259_v0 = vmul.f32 0.16666667, %v257_v60 }
 0x159   :  { %315 = vmatpush.msra.mxu3 %v259_v0 }
 0x15b   :  { %316 = vmatpush.msra.mxu3 %v258_v1 }
 0x15c   :  { %640 = vmatmul.msk.f32.vlgmr.msra.gmra.mxu3 %vm288_vm1, %v260_v2 }
 0x15d   :  { %376 = vmatpush.bf16.msrb.mxu3 %v651_v3 }
 0x164   :  { %641 = vmatmul.msk.f32.gmra.mxu3 %vm288_vm1, %v261_v5 }
 0x16c   :  { %642 = vmatmul.msk.f32.gmra.mxu3 %vm288_vm1, %v262_v6 }
 0x174   :  { %643 = vmatmul.msk.f32.gmra.mxu3 %vm288_vm1, %v263_v7 }
 0x1df   :  { %v318_v12 = vpop.f32.mrf.mxu3 }
 0x1e0   :  { %v319_v15 = vadd.f32 %v318_v12, %v271_v11 }
 0x1e7   :  { %v321_v14 = vpop.f32.mrf.mxu3 }
 0x1e8   :  { %v322_v20 = vadd.f32 %v321_v14, %v276_v13 }
 0x1ea   :  { %v330_v21 = vpack.c.bf16 %v322_v20, %v319_v15 }
 0x1ec   :  { %652 = vmatmul.msk.bf16.vlgmr.msrb.gmra.mxu2 %vm288_vm1, %v330_v21  ;;  %654 = vmatmul.msk.bf16.vlgmr.msrb.gmra.mxu3 %vm288_vm1, %v330_v21 }
 0x1ef   :  { %v324_v27 = vpop.f32.mrf.mxu3 }
 0x1f0   :  { %v325_v30 = vadd.f32 %v324_v27, %v281_v26 }
 0x1f7   :  { %v327_v29 = vpop.f32.mrf.mxu3 }
 0x1f8   :  { %v328_v31 = vadd.f32 %v327_v29, %v286_v28 }
 0x1fa   :  { %v331_v32 = vpack.c.bf16 %v328_v31, %v325_v30 }
 0x1fc   :  { %653 = vmatmul.msk.bf16.gmra.mxu2 %vm288_vm1, %v331_v32  ;;  %655 = vmatmul.msk.bf16.gmra.mxu3 %vm288_vm1, %v331_v32 }
 0x26f   :  { %v359_v33 = vpop.f32.mrf.mxu2  ;;  %v378_v34 = vpop.f32.mrf.mxu3 }
 0x270   :  { %v656_v35 = vmul.f32 -1.442695, %v359_v33  ;;  %v657_v36 = vmul.f32 -1.442695, %v378_v34 }
 0x272   :  { %689 = vpow2.f32 %v656_v35 }
 0x273   :  { %691 = vpow2.f32 %v657_v36 }
 0x277   :  { %v361_v37 = vpop.f32.mrf.mxu2  ;;  %v380_v38 = vpop.f32.mrf.mxu3 }
 0x278   :  { %v690_v39 = vpop.eup %689  ;;  %v658_v40 = vmul.f32 -1.442695, %v361_v37  ;;  %v659_v43 = vmul.f32 -1.442695, %v380_v38 }
 0x279   :  { %v692_v41 = vpop.eup %691  ;;  %v412_v42 = vadd.f32 1.0, %v690_v39 }
 0x27a   :  { %v413_v44 = vadd.f32 1.0, %v692_v41  ;;  %693 = vpow2.f32 %v658_v40 }
 0x27b   :  { %695 = vrcp.f32 %v412_v42  ;;  %v429_v57 = vand.u32 2147483647, %v412_v42  ;;  %v431_v59 = vand.u32 2147483648, %v412_v42  ;;  %vm425_vm3 = vweird.f32 %v412_v42 }
 0x27c   :  { %697 = vrcp.f32 %v413_v44  ;;  %v446_v61 = vand.u32 2147483648, %v413_v44  ;;  %v444_v0 = vand.u32 2147483647, %v413_v44  ;;  %vm440_vm6 = vweird.f32 %v413_v44 }
 0x27d   :  { %699 = vpow2.f32 %v659_v43  ;;  %vm430_vm5 = vcmp.eq.f32.partialorder %v429_v57, 8.507059e+37  ;;  %v432_v7 = vor.u32 1.1754944e-38, %v431_v59 }
 0x27e   :  { %v447_v9 = vor.u32 1.1754944e-38, %v446_v61  ;;  %vm445_vm9 = vcmp.eq.f32.partialorder %v444_v0, 8.507059e+37 }
 0x27f   :  { %v364_v45 = vpop.f32.mrf.mxu2  ;;  %v383_v46 = vpop.f32.mrf.mxu3 }
 0x280   :  { %v694_v47 = vpop.eup %693  ;;  %v660_v48 = vmul.f32 -1.442695, %v364_v45  ;;  %v661_v51 = vmul.f32 -1.442695, %v383_v46 }
 0x281   :  { %v696_v49 = vpop.eup %695  ;;  %v943_v50 = vadd.f32 1.0, %v694_v47 }
 0x282   :  { %v698_v52 = vpop.eup %697  ;;  %v421_v53 = vmul.f32 %v696_v49, %v412_v42  ;;  %701 = vpow2.f32 %v660_v48  ;;  %vm426_vm2 = vweird.f32 %v696_v49 }
 0x283   :  { %v700_v54 = vpop.eup %699  ;;  %v436_v55 = vmul.f32 %v698_v52, %v413_v44  ;;  %703 = vrcp.f32 %v943_v50  ;;  %vm441_vm4 = vweird.f32 %v698_v52  ;;  %vm427_vm7 = vmor %vm425_vm3, %vm426_vm2  ;;  %v461_v29 = vand.u32 2147483648, %v943_v50 }
 0x284   :  { %v422_v56 = vsub.f32 1.0, %v421_v53  ;;  %v946_v58 = vadd.f32 1.0, %v700_v54  ;;  %705 = vpow2.f32 %v661_v51  ;;  %vm442_vm8 = vmor %vm440_vm6, %vm441_vm4  ;;  %v459_v31 = vand.u32 2147483647, %v943_v50 }
 0x285   :  { %v437_v60 = vsub.f32 1.0, %v436_v55  ;;  %vm455_vm11 = vweird.f32 %v943_v50  ;;  %v462_v37 = vor.u32 1.1754944e-38, %v461_v29 }
 0x286   :  { %v423_v62 = vmul.f32 %v696_v49, %v422_v56  ;;  %707 = vrcp.f32 %v946_v58  ;;  %v476_v38 = vand.u32 2147483648, %v946_v58  ;;  %v474_v40 = vand.u32 2147483647, %v946_v58 }
 0x287   :  { %v438_v63 = vmul.f32 %v698_v52, %v437_v60  ;;  %v366_v1 = vpop.f32.mrf.mxu2  ;;  %v385_v2 = vpop.f32.mrf.mxu3  ;;  %vm460_vm14 = vcmp.eq.f32.partialorder %v459_v31, 8.507059e+37  ;;  %vm470_vm15 = vweird.f32 %v946_v58 }
 0x288   :  { %v702_v3 = vpop.eup %701  ;;  %v424_v4 = vadd.f32 %v696_v49, %v423_v62  ;;  %v662_v5 = vmul.f32 -1.442695, %v366_v1  ;;  %v663_v13 = vmul.f32 -1.442695, %v385_v2  ;;  %v477_v48 = vor.u32 1.1754944e-38, %v476_v38 }
 0x289   :  { %v704_v6 = vpop.eup %703  ;;  %v439_v8 = vadd.f32 %v698_v52, %v438_v63  ;;  %v949_v10 = vadd.f32 1.0, %v702_v3  ;;  %vm475_vm1 = vcmp.eq.f32.partialorder %v474_v40, 8.507059e+37 }
 0x28a   :  { %v428_v11 = vsel %vm427_vm7, %v696_v49, %v424_v4  ;;  %v451_v12 = vmul.f32 %v704_v6, %v943_v50  ;;  %709 = vpow2.f32 %v662_v5  ;;  %v706_v14 = vpop.eup %705  ;;  %vm456_vm10 = vweird.f32 %v704_v6 }
 0x28b   :  { %v433_v15 = vsel %vm430_vm5, %v432_v7, %v428_v11  ;;  %v443_v20 = vsel %vm442_vm8, %v698_v52, %v439_v8  ;;  %711 = vrcp.f32 %v949_v10  ;;  %v959_v34 = vadd.f32 1.0, %v706_v14  ;;  %vm457_vm12 = vmor %vm455_vm11, %vm456_vm10 }
 0x28c   :  { %v708_v21 = vpop.eup %707  ;;  %v540_v26 = vmul.f32 %v433_v15, %v842_v16  ;;  %v448_v27 = vsel %vm445_vm9, %v447_v9, %v443_v20  ;;  %v452_v28 = vsub.f32 1.0, %v451_v12  ;;  %713 = vpow2.f32 %v663_v13 }
 0x28d   :  { %v541_v30 = vmul.f32 %v448_v27, %v852_v18  ;;  %v466_v32 = vmul.f32 %v708_v21, %v946_v58  ;;  %715 = vrcp.f32 %v959_v34  ;;  %vm471_vm13 = vweird.f32 %v708_v21 }
 0x28e   :  { %548 = vst [vmem:[#allocation2] sm:$0xff] %v540_v26  ;;  %v453_v33 = vmul.f32 %v704_v6, %v452_v28  ;;  %vm472_vm0 = vmor %vm470_vm15, %vm471_vm13  ;;  %v491_v51 = vand.u32 2147483648, %v949_v10  ;;  %v489_v56 = vand.u32 2147483647, %v949_v10  ;;  %vm485_vm3 = vweird.f32 %v949_v10 }
 0x28f   :  { %549 = vst [vmem:[#allocation2 + $0x8] sm:$0xff] %v541_v30  ;;  %v467_v16 = vsub.f32 1.0, %v466_v32  ;;  %v506_v63 = vand.u32 2147483648, %v959_v34  ;;  %v504_v2 = vand.u32 2147483647, %v959_v34  ;;  %vm500_vm7 = vweird.f32 %v959_v34 }
 0x290   :  { %v710_v35 = vpop.eup %709  ;;  %v454_v36 = vadd.f32 %v704_v6, %v453_v33  ;;  %v492_v60 = vor.u32 1.1754944e-38, %v491_v51  ;;  %vm490_vm5 = vcmp.eq.f32.partialorder %v489_v56, 8.507059e+37 }
 0x291   :  { %v712_v18 = vpop.eup %711  ;;  %v468_v39 = vmul.f32 %v708_v21, %v467_v16  ;;  %v965_v41 = vadd.f32 1.0, %v710_v35  ;;  %v507_v8 = vor.u32 1.1754944e-38, %v506_v63  ;;  %vm505_vm10 = vcmp.eq.f32.partialorder %v504_v2, 8.507059e+37 }
 0x292   :  { %v458_v42 = vsel %vm457_vm12, %v704_v6, %v454_v36  ;;  %v481_v43 = vmul.f32 %v712_v18, %v949_v10  ;;  %v714_v46 = vpop.eup %713  ;;  %vm486_vm2 = vweird.f32 %v712_v18 }
 0x293   :  { %v463_v44 = vsel %vm460_vm14, %v462_v37, %v458_v42  ;;  %v469_v45 = vadd.f32 %v708_v21, %v468_v39  ;;  %717 = vrcp.f32 %v965_v41  ;;  %v972_v52 = vadd.f32 1.0, %v714_v46  ;;  %v716_v53 = vpop.eup %715  ;;  %vm487_vm4 = vmor %vm485_vm3, %vm486_vm2 }
 0x294   :  { %v542_v47 = vmul.f32 %v463_v44, %v847_v17  ;;  %v482_v49 = vsub.f32 1.0, %v481_v43  ;;  %v496_v17 = vmul.f32 %v716_v53, %v959_v34  ;;  %vm501_vm6 = vweird.f32 %v716_v53 }
 0x295   :  { %v473_v50 = vsel %vm472_vm0, %v708_v21, %v469_v45  ;;  %719 = vrcp.f32 %v972_v52  ;;  %v521_v6 = vand.u32 2147483648, %v965_v41  ;;  %vm502_vm8 = vmor %vm500_vm7, %vm501_vm6  ;;  %v519_v10 = vand.u32 2147483647, %v965_v41 }
 0x296   :  { %550 = vst [vmem:[#allocation2 + $0x10] sm:$0xff] %v542_v47  ;;  %v478_v54 = vsel %vm475_vm1, %v477_v48, %v473_v50  ;;  %v483_v55 = vmul.f32 %v712_v18, %v482_v49  ;;  %v497_v61 = vsub.f32 1.0, %v496_v17  ;;  %vm515_vm11 = vweird.f32 %v965_v41 }
 0x297   :  { %v543_v57 = vmul.f32 %v478_v54, %v857_v19  ;;  %v522_v15 = vor.u32 1.1754944e-38, %v521_v6  ;;  %vm520_vm13 = vcmp.eq.f32.partialorder %v519_v10, 8.507059e+37  ;;  %v536_v26 = vand.u32 2147483648, %v972_v52 }
 0x298   :  { %v484_v58 = vadd.f32 %v712_v18, %v483_v55  ;;  %v498_v19 = vmul.f32 %v716_v53, %v497_v61  ;;  %v534_v29 = vand.u32 2147483647, %v972_v52  ;;  %vm530_vm15 = vweird.f32 %v972_v52 }
 0x299   :  { %v718_v59 = vpop.eup %717  ;;  %551 = vst [vmem:[#allocation2 + $0x18] sm:$0xff] %v543_v57 }
 0x29a   :  { %v488_v62 = vsel %vm487_vm4, %v712_v18, %v484_v58  ;;  %v511_v0 = vmul.f32 %v718_v59, %v965_v41  ;;  %v499_v5 = vadd.f32 %v716_v53, %v498_v19  ;;  %vm516_vm9 = vweird.f32 %v718_v59 }
 0x29b   :  { %v493_v1 = vsel %vm490_vm5, %v492_v60, %v488_v62  ;;  %v720_v7 = vpop.eup %719  ;;  %vm517_vm12 = vmor %vm515_vm11, %vm516_vm9  ;;  %vm535_vm1 = vcmp.eq.f32.partialorder %v534_v29, 8.507059e+37 }
 0x29c   :  { %v544_v3 = vmul.f32 %v493_v1, %v866_v22  ;;  %v512_v4 = vsub.f32 1.0, %v511_v0  ;;  %v503_v11 = vsel %vm502_vm8, %v716_v53, %v499_v5  ;;  %v526_v12 = vmul.f32 %v720_v7, %v972_v52 }
 0x29d   :  { %v508_v13 = vsel %vm505_vm10, %v507_v8, %v503_v11  ;;  %vm531_vm14 = vweird.f32 %v720_v7 }
 0x29e   :  { %552 = vst [vmem:[#allocation2 + $0x20] sm:$0xff] %v544_v3  ;;  %v513_v9 = vmul.f32 %v718_v59, %v512_v4  ;;  %v545_v14 = vmul.f32 %v508_v13, %v876_v24  ;;  %v527_v20 = vsub.f32 1.0, %v526_v12  ;;  %vm532_vm0 = vmor %vm530_vm15, %vm531_vm14  ;;  %v537_v24 = vor.u32 1.1754944e-38, %v536_v26 }
 0x2a0   :  { %v514_v22 = vadd.f32 %v718_v59, %v513_v9  ;;  %553 = vst [vmem:[#allocation2 + $0x28] sm:$0xff] %v545_v14  ;;  %v528_v28 = vmul.f32 %v720_v7, %v527_v20 }
 0x2a2   :  { %v518_v21 = vsel %vm517_vm12, %v718_v59, %v514_v22  ;;  %v529_v31 = vadd.f32 %v720_v7, %v528_v28 }
 0x2a3   :  { %v523_v27 = vsel %vm520_vm13, %v522_v15, %v518_v21 }
 0x2a4   :  { %v546_v30 = vmul.f32 %v523_v27, %v871_v23  ;;  %v533_v32 = vsel %vm532_vm0, %v720_v7, %v529_v31 }
 0x2a5   :  { %v538_v33 = vsel %vm535_vm1, %v537_v24, %v533_v32 }
 0x2a6   :  { %554 = vst [vmem:[#allocation2 + $0x30] sm:$0xff] %v546_v30  ;;  %v547_v34 = vmul.f32 %v538_v33, %v881_v25 }
 0x2a8   :  { %555 = vst [vmem:[#allocation2 + $0x38] sm:$0xff] %v547_v34 }
 0x2a9   :  { %568 = dma.vmem_to_hbm [thread:$0]  %s561_s5, 1024, %s563_s30, [#allocation3], %s749_s8, %s749_s8, %s750_s4  }
 0x2aa   :  { %745 = dma.done.wait [#allocation3], 1024  }
 0x2ab   :  { %746 = vsyncadd [#allocation3], 4294966272 }
 0x2ac   :  { %573 = vsyncpa [#allocation3], 1 }

</bundles_post_ra>
